<compile_context>
chip_gen: v7x
topology: tpu7x:2x2x1
jax: 0.10.0
libtpu: 0.0.40
codegen_flags: <defaults>
</compile_context>

<pallas_src>
import functools

import jax
import jax.numpy as jnp
from jax.experimental import pallas as pl
from jax.experimental.pallas import tpu as pltpu


_LANE = 128          # last-dim (lane) granularity
_SUBLANE_F32 = 8     # f32 sublane packing
_SUBLANE_BF16 = 16   # bf16 sublane packing


def _round_up(n, m):
    return ((n + m - 1) // m) * m


def _mlp_fused_kernel(*refs, n_layers, apply_relu):
    """Fused MLP body.

    refs = (x_ref, w1_ref, b1_ref, ..., wN_ref, bN_ref, o_ref)
      x_ref : (tile_b, D0_pad)            f32 (or bf16)
      wL    : (D_{L-1}_pad, D_L_pad)      f32 or bf16 (sets MXU input dtype)
      bL    : (1, D_L_pad)                f32
      o_ref : (tile_b, D_last_pad)        f32
    Intermediates stay in vregs/VMEM; the layer loop is unrolled at trace time.
    """
    x_ref = refs[0]
    o_ref = refs[1 + 2 * n_layers]

    h = x_ref[...]
    for lyr in range(n_layers):
        w_ref = refs[1 + 2 * lyr]
        b_ref = refs[2 + 2 * lyr]
        # MXU matmul with f32 accumulation; the weight dtype sets the MXU
        # input dtype (exact f32 path by default, bf16 optional on v6e/v7x).
        y = jnp.dot(h.astype(w_ref.dtype), w_ref[...],
                    preferred_element_type=jnp.float32)
        y = y + b_ref[...]                       # (1, D) -> (tile_b, D) broadcast
        if apply_relu:
            y = jnp.maximum(y, 0.0)              # VPU, stays f32 (v5e-safe)
        h = y
    o_ref[...] = h.astype(o_ref.dtype)


def mlp_forward(params, x, activation="relu", compute_dtype=jnp.float32):
    """Run the whole MLP as one fused Pallas kernel.

    params: list of (w_t, b) with w_t of shape (D_in, D_out) (transposed from
            torch's (out, in) layout) and b of shape (D_out,).
    x:      (B, D_in) float32
    """
    apply_relu = (activation != "none")   # mirrors the nn.Module exactly
    n_layers = len(params)
    B, D0 = x.shape

    dims = [D0] + [w.shape[1] for (w, _) in params]
    dims_pad = [_round_up(d, _LANE) for d in dims]

    sublane = _SUBLANE_BF16 if compute_dtype == jnp.bfloat16 else _SUBLANE_F32
    B_pad = _round_up(B, sublane)
    # One batch tile up to 256 rows; larger batches get a "parallel" grid axis
    # so both TensorCores on v7x get work while weights stay resident in VMEM.
    if B_pad <= 256:
        tile_b = B_pad
    else:
        B_pad = _round_up(B_pad, 256)
        tile_b = 256
    n_btiles = B_pad // tile_b

    # --- pad (and optionally cast) operands; zero padding is exact ---------
    x_pad = jnp.pad(x.astype(jnp.float32),
                    ((0, B_pad - B), (0, dims_pad[0] - D0)))
    flat_inputs = [x_pad]
    for lyr, (w_t, b) in enumerate(params):
        din, dout = w_t.shape
        w_pad = jnp.pad(w_t.astype(compute_dtype),
                        ((0, dims_pad[lyr] - din), (0, dims_pad[lyr + 1] - dout)))
        b_pad = jnp.pad(b.astype(jnp.float32),
                        (0, dims_pad[lyr + 1] - dout)).reshape(1, -1)
        flat_inputs += [w_pad, b_pad]

    # All padded weights + a few activation tiles must fit in scoped VMEM for
    # this fused, un-tiled-K/N kernel (fine for MLP-block-sized layers).
    # TODO(synk): for production-size layers switch to an (M, N, K)-tiled grid
    # with an f32 VMEM accumulator + pl.when init/finalize.
    param_bytes = sum(int(a.size) * a.dtype.itemsize for a in flat_inputs[1:])
    act_bytes = tile_b * max(dims_pad) * 4
    vmem_need = 2 * param_bytes + 2 * int(x_pad.size // n_btiles) * 4 + 4 * act_bytes
    if vmem_need > 24 * 1024 * 1024:
        raise ValueError(
            "MLP too large for the fused single-tile kernel; needs the tiled "
            "(M,N,K) variant.")

    # --- block specs --------------------------------------------------------
    in_specs = [pl.BlockSpec((tile_b, dims_pad[0]), lambda i: (i, 0))]
    for lyr in range(n_layers):
        # Constant index_map -> the same weight/bias block across all batch
        # tiles (no re-DMA between consecutive grid steps).
        in_specs.append(
            pl.BlockSpec((dims_pad[lyr], dims_pad[lyr + 1]), lambda i: (0, 0)))
        in_specs.append(
            pl.BlockSpec((1, dims_pad[lyr + 1]), lambda i: (0, 0)))
    out_spec = pl.BlockSpec((tile_b, dims_pad[-1]), lambda i: (i, 0))

    flops = 2 * B_pad * sum(dims_pad[l] * dims_pad[l + 1]
                            for l in range(n_layers))
    bytes_accessed = (int(x_pad.size) * 4 + param_bytes
                      + B_pad * dims_pad[-1] * 4)
    cost = pl.CostEstimate(flops=flops, transcendentals=0,
                           bytes_accessed=bytes_accessed)

    kernel = functools.partial(_mlp_fused_kernel,
                               n_layers=n_layers, apply_relu=apply_relu)
    out_pad = pl.pallas_call(
        kernel,
        out_shape=jax.ShapeDtypeStruct((B_pad, dims_pad[-1]), jnp.float32),
        grid_spec=pl.GridSpec(
            grid=(n_btiles,),
            in_specs=in_specs,
            out_specs=out_spec,
        ),
        compiler_params=pltpu.CompilerParams(
            dimension_semantics=("parallel",),
            vmem_limit_bytes=64 * 1024 * 1024,
        ),
        cost_estimate=cost,
    )(*flat_inputs)

    return out_pad[:B, :dims[-1]]


def init_mlp_params(key, input_dim, dimensions):
    """Deterministic init mirroring nn.Linear's default
    (uniform(-1/sqrt(fan_in), 1/sqrt(fan_in))). Weights are stored
    pre-transposed as (in, out) so the kernel computes y = x @ W_t + b."""
    dims = [input_dim] + list(dimensions)
    params = []
    for lyr in range(len(dims) - 1):
        fan_in, fan_out = dims[lyr], dims[lyr + 1]
        key, kw, kb = jax.random.split(key, 3)
        bound = 1.0 / jnp.sqrt(fan_in)
        w_t = jax.random.uniform(
            kw, (fan_in, fan_out), jnp.float32, minval=-bound, maxval=bound)
        b = jax.random.uniform(
            kb, (fan_out,), jnp.float32, minval=-bound, maxval=bound)
        params.append((w_t, b))
    return params


if __name__ == "__main__":
    key = jax.random.PRNGKey(0)

    # Small shapes consistent with the module: MLP(input_dim=32, dimensions=[64, 32, 16])
    batch = 8
    input_dim = 32
    dimensions = [64, 32, 16]

    key, kx = jax.random.split(key)
    x = jax.random.normal(kx, (batch, input_dim), dtype=jnp.float32)
    params = init_mlp_params(key, input_dim, dimensions)

    fwd = jax.jit(lambda p, xx: mlp_forward(p, xx, activation="relu"))
    out = jax.block_until_ready(fwd(params, x))

    # Sanity check against a plain-JAX f32 reference of the same math
    # (ReLU after every layer, matching the PyTorch module).
    ref = x
    for (w_t, b) in params:
        ref = jnp.maximum(ref @ w_t + b, 0.0)
    assert out.shape == (batch, dimensions[-1])
    assert jnp.allclose(out, ref, atol=1e-5, rtol=1e-5), (
        float(jnp.max(jnp.abs(out - ref))))

    print("KERNEL_OK")
</pallas_src>

<mosaic_0001>
module attributes {stable_mosaic.version = 11 : i64} {
  func.func @_mlp_fused_kernel(%arg0: i32, %arg1: memref<8x128xf32, #tpu.memory_space<vmem>>, %arg2: memref<128x128xf32, #tpu.memory_space<vmem>>, %arg3: memref<1x128xf32, #tpu.memory_space<vmem>>, %arg4: memref<128x128xf32, #tpu.memory_space<vmem>>, %arg5: memref<1x128xf32, #tpu.memory_space<vmem>>, %arg6: memref<128x128xf32, #tpu.memory_space<vmem>>, %arg7: memref<1x128xf32, #tpu.memory_space<vmem>>, %arg8: memref<8x128xf32, #tpu.memory_space<vmem>>) attributes {dimension_semantics = [#tpu.dimension_semantics<parallel>], iteration_bounds = array<i64: 1>, scalar_prefetch = 0 : i64, scratch_operands = 0 : i64, tpu.core_type = #tpu.core_type<tc>, window_params = [{transform_indices = @transform_0, window_bounds = array<i64: 8, 128>}, {pipeline_mode = #tpu.pipeline_mode<synchronous>, transform_indices = @transform_1, window_bounds = array<i64: 128, 128>}, {pipeline_mode = #tpu.pipeline_mode<synchronous>, transform_indices = @transform_2, window_bounds = array<i64: 1, 128>}, {pipeline_mode = #tpu.pipeline_mode<synchronous>, transform_indices = @transform_3, window_bounds = array<i64: 128, 128>}, {pipeline_mode = #tpu.pipeline_mode<synchronous>, transform_indices = @transform_4, window_bounds = array<i64: 1, 128>}, {pipeline_mode = #tpu.pipeline_mode<synchronous>, transform_indices = @transform_5, window_bounds = array<i64: 128, 128>}, {pipeline_mode = #tpu.pipeline_mode<synchronous>, transform_indices = @transform_6, window_bounds = array<i64: 1, 128>}, {transform_indices = @transform_7, window_bounds = array<i64: 8, 128>}]} {
    %c0 = arith.constant 0 : index
    %c0_0 = arith.constant 0 : index
    %0 = vector.load %arg1[%c0, %c0_0] : memref<8x128xf32, #tpu.memory_space<vmem>>, vector<8x128xf32>
    %c0_1 = arith.constant 0 : index
    %c0_2 = arith.constant 0 : index
    %1 = vector.load %arg2[%c0_1, %c0_2] : memref<128x128xf32, #tpu.memory_space<vmem>>, vector<128x128xf32>
    %cst = arith.constant dense<0.000000e+00> : vector<8x128xf32>
    %2 = tpu.matmul %0, %1, %cst {dimension_numbers = #tpu.dot_dimension_numbers<[1], [0], [0], [1], [0, 0, 1, 1], [], []>} : vector<8x128xf32>, vector<128x128xf32>, vector<8x128xf32> -> vector<8x128xf32>
    %c0_3 = arith.constant 0 : index
    %c0_4 = arith.constant 0 : index
    %3 = vector.load %arg3[%c0_3, %c0_4] : memref<1x128xf32, #tpu.memory_space<vmem>>, vector<1x128xf32>
    %4 = vector.broadcast %3 : vector<1x128xf32> to vector<8x128xf32>
    %5 = arith.addf %2, %4 : vector<8x128xf32>
    %cst_5 = arith.constant 0.000000e+00 : f32
    %6 = vector.broadcast %cst_5 : f32 to vector<8x128xf32>
    %7 = arith.maximumf %5, %6 : vector<8x128xf32>
    %c0_6 = arith.constant 0 : index
    %c0_7 = arith.constant 0 : index
    %8 = vector.load %arg4[%c0_6, %c0_7] : memref<128x128xf32, #tpu.memory_space<vmem>>, vector<128x128xf32>
    %cst_8 = arith.constant dense<0.000000e+00> : vector<8x128xf32>
    %9 = tpu.matmul %7, %8, %cst_8 {dimension_numbers = #tpu.dot_dimension_numbers<[1], [0], [0], [1], [0, 0, 1, 1], [], []>} : vector<8x128xf32>, vector<128x128xf32>, vector<8x128xf32> -> vector<8x128xf32>
    %c0_9 = arith.constant 0 : index
    %c0_10 = arith.constant 0 : index
    %10 = vector.load %arg5[%c0_9, %c0_10] : memref<1x128xf32, #tpu.memory_space<vmem>>, vector<1x128xf32>
    %11 = vector.broadcast %10 : vector<1x128xf32> to vector<8x128xf32>
    %12 = arith.addf %9, %11 : vector<8x128xf32>
    %cst_11 = arith.constant 0.000000e+00 : f32
    %13 = vector.broadcast %cst_11 : f32 to vector<8x128xf32>
    %14 = arith.maximumf %12, %13 : vector<8x128xf32>
    %c0_12 = arith.constant 0 : index
    %c0_13 = arith.constant 0 : index
    %15 = vector.load %arg6[%c0_12, %c0_13] : memref<128x128xf32, #tpu.memory_space<vmem>>, vector<128x128xf32>
    %cst_14 = arith.constant dense<0.000000e+00> : vector<8x128xf32>
    %16 = tpu.matmul %14, %15, %cst_14 {dimension_numbers = #tpu.dot_dimension_numbers<[1], [0], [0], [1], [0, 0, 1, 1], [], []>} : vector<8x128xf32>, vector<128x128xf32>, vector<8x128xf32> -> vector<8x128xf32>
    %c0_15 = arith.constant 0 : index
    %c0_16 = arith.constant 0 : index
    %17 = vector.load %arg7[%c0_15, %c0_16] : memref<1x128xf32, #tpu.memory_space<vmem>>, vector<1x128xf32>
    %18 = vector.broadcast %17 : vector<1x128xf32> to vector<8x128xf32>
    %19 = arith.addf %16, %18 : vector<8x128xf32>
    %cst_17 = arith.constant 0.000000e+00 : f32
    %20 = vector.broadcast %cst_17 : f32 to vector<8x128xf32>
    %21 = arith.maximumf %19, %20 : vector<8x128xf32>
    %c0_18 = arith.constant 0 : index
    %c0_19 = arith.constant 0 : index
    %22 = vector.load %arg8[%c0_18, %c0_19] : memref<8x128xf32, #tpu.memory_space<vmem>>, vector<8x128xf32>
    tpu.vector_store %arg8[%c0_18, %c0_19], %21 {strides = array<i32>} : memref<8x128xf32, #tpu.memory_space<vmem>>, vector<8x128xf32>,
    return
  }
  func.func @transform_0(%arg0: i32) -> (i32, i32) {
    %c0_i32 = arith.constant 0 : i32
    %c0_i32_0 = arith.constant 0 : i32
    return %arg0, %c0_i32 : i32, i32
  }
  func.func @transform_1(%arg0: i32) -> (i32, i32) {
    %c0_i32 = arith.constant 0 : i32
    %c0_i32_0 = arith.constant 0 : i32
    %c0_i32_1 = arith.constant 0 : i32
    return %c0_i32, %c0_i32_0 : i32, i32
  }
  func.func @transform_2(%arg0: i32) -> (i32, i32) {
    %c0_i32 = arith.constant 0 : i32
    %c0_i32_0 = arith.constant 0 : i32
    %c0_i32_1 = arith.constant 0 : i32
    return %c0_i32, %c0_i32_0 : i32, i32
  }
  func.func @transform_3(%arg0: i32) -> (i32, i32) {
    %c0_i32 = arith.constant 0 : i32
    %c0_i32_0 = arith.constant 0 : i32
    %c0_i32_1 = arith.constant 0 : i32
    return %c0_i32, %c0_i32_0 : i32, i32
  }
  func.func @transform_4(%arg0: i32) -> (i32, i32) {
    %c0_i32 = arith.constant 0 : i32
    %c0_i32_0 = arith.constant 0 : i32
    %c0_i32_1 = arith.constant 0 : i32
    return %c0_i32, %c0_i32_0 : i32, i32
  }
  func.func @transform_5(%arg0: i32) -> (i32, i32) {
    %c0_i32 = arith.constant 0 : i32
    %c0_i32_0 = arith.constant 0 : i32
    %c0_i32_1 = arith.constant 0 : i32
    return %c0_i32, %c0_i32_0 : i32, i32
  }
  func.func @transform_6(%arg0: i32) -> (i32, i32) {
    %c0_i32 = arith.constant 0 : i32
    %c0_i32_0 = arith.constant 0 : i32
    %c0_i32_1 = arith.constant 0 : i32
    return %c0_i32, %c0_i32_0 : i32, i32
  }
  func.func @transform_7(%arg0: i32) -> (i32, i32) {
    %c0_i32 = arith.constant 0 : i32
    %c0_i32_0 = arith.constant 0 : i32
    return %arg0, %c0_i32 : i32, i32
  }
}

</mosaic_0001>

<bundles_post_ra>
// kernel: _lambda_.1
= control target key start
LH: loop header
LB: loop body
LE: loop exit
PB: predicated region body
PF: predicated region fallthrough
CT: control target
= control target key end

     0   :  { %12 = vsyncpa [#allocation3], 0  ;;  %s1034_s0 = inlined_call_operand.hbm [shape: f32[8,128], index: 0, kind: input, shape index: {}]   ;;  %s1035_s1 = inlined_call_operand.hbm [shape: f32[128,128], index: 1, kind: input, shape index: {}]   ;;  %s1036_s2 = inlined_call_operand.hbm [shape: f32[1,128], index: 2, kind: input, shape index: {}]   ;;  %s1037_s3 = inlined_call_operand.hbm [shape: f32[128,128], index: 3, kind: input, shape index: {}]   ;;  %s1038_s4 = inlined_call_operand.hbm [shape: f32[1,128], index: 4, kind: input, shape index: {}]   ;;  %s1039_s5 = inlined_call_operand.hbm [shape: f32[128,128], index: 5, kind: input, shape index: {}]   ;;  %s1040_s6 = inlined_call_operand.hbm [shape: f32[1,128], index: 6, kind: input, shape index: {}]   ;;  %s1041_s7 = inlined_call_operand.hbm [shape: f32[8,128], index: 7, kind: output, shape index: {}]  }
   0x1   :  { %13 = vsyncpa [#allocation6], 0 }
   0x2   :  { %14 = vsyncpa [#allocation9], 0 }
   0x3   :  { %15 = vsyncpa [#allocation12], 0 }
   0x4   :  { %16 = vsyncpa [#allocation4], 0  ;;  %s846_s24 = smov [#allocation5]   ;;  %s660_s28 = scalar_lea.hbm %s1035_s1, 2048 }
   0x5   :  { %s32_s25 = sshll.u32 %s846_s24, 4  ;;  %p661_p0 = scmp.ne.s32.totalorder %s1035_s1, %s660_s28  ;;  %s33_s25 = int_to_ptr.vmem [resolvable:$true] %s32_s25 }
   0x6   :  { %p664_p1 = scmp.lt.u32.totalorder %s660_s28, %s1035_s1 }
   0x8   :  { %p666_p2 = pnand %p664_p1, %p661_p0 }
   0xa   :  { %669 = shalt.err (!%p666_p2)
}
   0xb   :  { %s670_s10 = scalar_lea.vmem %s33_s25, 2048  ;;  %p675_p4 = scmp.lt.s32.totalorder %s33_s25, %s33_s25 }
   0xc   :  { %p671_p3 = scmp.ne.s32.totalorder %s33_s25, %s670_s10  ;;  %p676_p5 = scmp.lt.s32.totalorder %s670_s10, %s670_s10 }
   0xe   :  { %p677_p6 = por %p676_p5, %p675_p4 }
  0x10   :  { %p678_p7 = pnand %p677_p6, %p671_p3 }
  0x12   :  { %681 = shalt.err (!%p678_p7)
}
  0x13   :  { %s847_s11 = smov 128   ;;  %s848_s12 = smov 8  }
  0x14   :  { %38 = dma.hbm_to_vmem [thread:$0]  %s1035_s1, 2048, %s33_s25, [#allocation6], %s847_s11, %s847_s11, %s848_s12  }
  0x15   :  { %s849_s15 = smov [#allocation8]   ;;  %s850_s17 = smov [#allocation11]  }
  0x16   :  { %s54_s16 = sshll.u32 %s849_s15, 4  ;;  %s76_s18 = sshll.u32 %s850_s17, 4  ;;  %s55_s16 = int_to_ptr.vmem [resolvable:$true] %s54_s16  ;;  %s77_s18 = int_to_ptr.vmem [resolvable:$true] %s76_s18 }
  0x17   :  { %s682_s21 = scalar_lea.hbm %s1037_s3, 2048 }
  0x18   :  { %p683_p8 = scmp.ne.s32.totalorder %s1037_s3, %s682_s21  ;;  %p686_p9 = scmp.lt.u32.totalorder %s682_s21, %s1037_s3 }
  0x1a   :  { %p688_p10 = pnand %p686_p9, %p683_p8 }
  0x1c   :  { %691 = shalt.err (!%p688_p10)
}
  0x1d   :  { %s692_s1 = scalar_lea.vmem %s55_s16, 2048  ;;  %p697_p12 = scmp.lt.s32.totalorder %s55_s16, %s55_s16 }
  0x1e   :  { %p693_p11 = scmp.ne.s32.totalorder %s55_s16, %s692_s1  ;;  %p698_p13 = scmp.lt.s32.totalorder %s692_s1, %s692_s1 }
  0x20   :  { %p699_p0 = por %p698_p13, %p697_p12 }
  0x22   :  { %p700_p1 = pnand %p699_p0, %p693_p11 }
  0x24   :  { %703 = shalt.err (!%p700_p1)
}
  0x25   :  { %60 = dma.hbm_to_vmem [thread:$0]  %s1037_s3, 2048, %s55_s16, [#allocation9], %s847_s11, %s847_s11, %s848_s12  }
  0x26   :  { %s704_s30 = scalar_lea.hbm %s1039_s5, 2048 }
  0x27   :  { %p705_p2 = scmp.ne.s32.totalorder %s1039_s5, %s704_s30  ;;  %p708_p3 = scmp.lt.u32.totalorder %s704_s30, %s1039_s5 }
  0x29   :  { %p710_p4 = pnand %p708_p3, %p705_p2 }
  0x2b   :  { %713 = shalt.err (!%p710_p4)
}
  0x2c   :  { %s714_s14 = scalar_lea.vmem %s77_s18, 2048  ;;  %p719_p6 = scmp.lt.s32.totalorder %s77_s18, %s77_s18 }
  0x2d   :  { %p715_p5 = scmp.ne.s32.totalorder %s77_s18, %s714_s14  ;;  %p720_p7 = scmp.lt.s32.totalorder %s714_s14, %s714_s14 }
  0x2f   :  { %p721_p8 = por %p720_p7, %p719_p6 }
  0x31   :  { %p722_p9 = pnand %p721_p8, %p715_p5 }
  0x33   :  { %725 = shalt.err (!%p722_p9)
}
  0x34   :  { %82 = dma.hbm_to_vmem [thread:$0]  %s1039_s5, 2048, %s77_s18, [#allocation12], %s847_s11, %s847_s11, %s848_s12  }
  0x35   :  { %s851_s16 = smov [#allocation2]   ;;  %s852_s19 = smov [#allocation7]  }
  0x36   :  { %s23_s17 = sshll.u32 %s851_s16, 4  ;;  %s45_s20 = sshll.u32 %s852_s19, 4  ;;  %s24_s17 = int_to_ptr.vmem [resolvable:$true] %s23_s17  ;;  %s46_s20 = int_to_ptr.vmem [resolvable:$true] %s45_s20 }
  0x37   :  { %s726_s23 = scalar_lea.hbm %s1034_s0, 128 }
  0x38   :  { %p727_p10 = scmp.ne.s32.totalorder %s1034_s0, %s726_s23  ;;  %p730_p11 = scmp.lt.u32.totalorder %s726_s23, %s1034_s0 }
  0x3a   :  { %p732_p12 = pnand %p730_p11, %p727_p10 }
  0x3c   :  { %735 = shalt.err (!%p732_p12)
}
  0x3d   :  { %s736_s5 = scalar_lea.vmem %s24_s17, 128  ;;  %p741_p0 = scmp.lt.s32.totalorder %s24_s17, %s24_s17 }
  0x3e   :  { %p737_p13 = scmp.ne.s32.totalorder %s24_s17, %s736_s5  ;;  %p742_p1 = scmp.lt.s32.totalorder %s736_s5, %s736_s5 }
  0x40   :  { %p743_p2 = por %p742_p1, %p741_p0 }
  0x42   :  { %p744_p3 = pnand %p743_p2, %p737_p13 }
  0x44   :  { %747 = shalt.err (!%p744_p3)
}
  0x45   :  { %26 = dma.hbm_to_vmem [thread:$0]  %s1034_s0, 128, %s24_s17, [#allocation3]  }
  0x46   :  { %s748_s28 = scalar_lea.hbm %s1036_s2, 16 }
  0x47   :  { %p749_p4 = scmp.ne.s32.totalorder %s1036_s2, %s748_s28  ;;  %p752_p5 = scmp.lt.u32.totalorder %s748_s28, %s1036_s2 }
  0x49   :  { %p754_p6 = pnand %p752_p5, %p749_p4 }
  0x4b   :  { %757 = shalt.err (!%p754_p6)
}
  0x4c   :  { %s758_s10 = scalar_lea.vmem %s46_s20, 16  ;;  %s762_s13 = scalar_lea.vmem %s46_s20, 32 }
  0x4d   :  { %p759_p7 = scmp.ne.s32.totalorder %s46_s20, %s758_s10  ;;  %p763_p8 = scmp.lt.s32.totalorder %s46_s20, %s46_s20 }
  0x4e   :  { %p764_p9 = scmp.lt.s32.totalorder %s762_s13, %s758_s10 }
  0x50   :  { %p765_p10 = por %p764_p9, %p763_p8 }
  0x52   :  { %p766_p11 = pnand %p765_p10, %p759_p7 }
  0x54   :  { %769 = shalt.err (!%p766_p11)
}
  0x55   :  { %48 = dma.hbm_to_vmem [thread:$0]  %s1036_s2, 16, %s46_s20, [#allocation6]  }
  0x56   :  { %s853_s3 = smov [#allocation10]   ;;  %s854_s16 = smov [#allocation13]  }
  0x57   :  { %s67_s15 = sshll.u32 %s853_s3, 4  ;;  %s89_s17 = sshll.u32 %s854_s16, 4  ;;  %s68_s15 = int_to_ptr.vmem [resolvable:$true] %s67_s15  ;;  %s90_s17 = int_to_ptr.vmem [resolvable:$true] %s89_s17 }
  0x58   :  { %s770_s22 = scalar_lea.hbm %s1038_s4, 16 }
  0x59   :  { %p771_p12 = scmp.ne.s32.totalorder %s1038_s4, %s770_s22  ;;  %p774_p13 = scmp.lt.u32.totalorder %s770_s22, %s1038_s4 }
  0x5b   :  { %p776_p0 = pnand %p774_p13, %p771_p12 }
  0x5d   :  { %779 = shalt.err (!%p776_p0)
}
  0x5e   :  { %s780_s2 = scalar_lea.vmem %s68_s15, 16  ;;  %s784_s20 = scalar_lea.vmem %s68_s15, 32 }
  0x5f   :  { %p781_p1 = scmp.ne.s32.totalorder %s68_s15, %s780_s2  ;;  %p785_p2 = scmp.lt.s32.totalorder %s68_s15, %s68_s15 }
  0x60   :  { %p786_p3 = scmp.lt.s32.totalorder %s784_s20, %s780_s2 }
  0x62   :  { %p787_p4 = por %p786_p3, %p785_p2 }
  0x64   :  { %p788_p5 = pnand %p787_p4, %p781_p1 }
  0x66   :  { %791 = shalt.err (!%p788_p5)
}
  0x67   :  { %70 = dma.hbm_to_vmem [thread:$0]  %s1038_s4, 16, %s68_s15, [#allocation9]  }
  0x68   :  { %s792_s18 = scalar_lea.hbm %s1040_s6, 16 }
  0x69   :  { %p793_p6 = scmp.ne.s32.totalorder %s1040_s6, %s792_s18  ;;  %p796_p7 = scmp.lt.u32.totalorder %s792_s18, %s1040_s6 }
  0x6b   :  { %p798_p8 = pnand %p796_p7, %p793_p6 }
  0x6d   :  { %801 = shalt.err (!%p798_p8)
}
  0x6e   :  { %s802_s8 = scalar_lea.vmem %s90_s17, 16  ;;  %s806_s9 = scalar_lea.vmem %s90_s17, 32 }
  0x6f   :  { %p803_p9 = scmp.ne.s32.totalorder %s90_s17, %s802_s8  ;;  %p807_p10 = scmp.lt.s32.totalorder %s90_s17, %s90_s17 }
  0x70   :  { %p808_p11 = scmp.lt.s32.totalorder %s806_s9, %s802_s8 }
  0x72   :  { %p809_p12 = por %p808_p11, %p807_p10 }
  0x74   :  { %p810_p13 = pnand %p809_p12, %p803_p9 }
  0x76   :  { %813 = shalt.err (!%p810_p13)
}
  0x77   :  { %92 = dma.hbm_to_vmem [thread:$0]  %s1040_s6, 16, %s90_s17, [#allocation12]  }
  0x78   :  { %836 = dma.done.wait [#allocation3], 128  }
  0x79   :  { %837 = vsyncadd [#allocation3], 4294967168 }
  0x7a   :  { %838 = dma.done.wait [#allocation6], 2064  }
  0x7b   :  { %839 = vsyncadd [#allocation6], 4294965232 }
  0x7c   :  { %840 = dma.done.wait [#allocation9], 2064  }
  0x7d   :  { %841 = vsyncadd [#allocation9], 4294965232 }
  0x7e   :  { %842 = dma.done.wait [#allocation12], 2064  }
  0x7f   :  { %843 = vsyncadd [#allocation12], 4294965232  ;;  %v855_v0 = vmov 0.0|0.0   ;;  %vm856_vm0 = vmmov 0   ;;  %v857_v1 = vmov 0.0   ;;  %v115_v2 = vld [vmem:[#allocation5] sm:$0xff] }
  0x80   :  { %575 = vmatprep.subr.bf16.mxu0 %v855_v0  ;;  %502 = vmatprep.mubr.msk.f32.mxu0 %vm856_vm0, %v857_v1  ;;  %v116_v3 = vld [vmem:[#allocation5 + $0x8] sm:$0xff]  ;;  %v117_v4 = vld [vmem:[#allocation5 + $0x10] sm:$0xff]  ;;  %v118_v6 = vld [vmem:[#allocation5 + $0x18] sm:$0xff]  ;;  %s858_s6 = smov [#allocation14]  }
  0x81   :  { %599 = vmatprep.subr.bf16.mxu1 %v855_v0  ;;  %537 = vmatprep.mubr.msk.f32.mxu1 %vm856_vm0, %v857_v1  ;;  %v576_v5 = vpack.c.bf16 %v116_v3, %v115_v2  ;;  %v579_v7 = vpack.c.bf16 %v118_v6, %v117_v4  ;;  %v119_v8 = vld [vmem:[#allocation5 + $0x20] sm:$0xff]  ;;  %v120_v9 = vld [vmem:[#allocation5 + $0x28] sm:$0xff]  ;;  %v211_v12 = vld [vmem:[#allocation8 + $0x10] sm:$0xff]  ;;  %s404_s13 = sshll.u32 %s858_s6, 4  ;;  %s405_s13 = int_to_ptr.vmem [resolvable:$true] %s404_s13 }
  0x82   :  { %v209_v10 = vld [vmem:[#allocation8] sm:$0xff]  ;;  %v210_v11 = vld [vmem:[#allocation8 + $0x8] sm:$0xff]  ;;  %v212_v13 = vld [vmem:[#allocation8 + $0x18] sm:$0xff]  ;;  %v582_v14 = vpack.c.bf16 %v120_v9, %v119_v8  ;;  %s814_s0 = scalar_lea.vmem %s405_s13, 128  ;;  %p819_p1 = scmp.lt.s32.totalorder %s405_s13, %s405_s13 }
  0x83   :  { %577 = vmatpush3.bf16.msra.mxu0 %v576_v5  ;;  %v600_v15 = vpack.c.bf16 %v210_v11, %v209_v10  ;;  %v121_v16 = vld [vmem:[#allocation5 + $0x30] sm:$0xff]  ;;  %v122_v17 = vld [vmem:[#allocation5 + $0x38] sm:$0xff]  ;;  %v603_v18 = vpack.c.bf16 %v212_v13, %v211_v12  ;;  %v213_v19 = vld [vmem:[#allocation8 + $0x20] sm:$0xff]  ;;  %p815_p0 = scmp.ne.s32.totalorder %s405_s13, %s814_s0  ;;  %p820_p2 = scmp.lt.s32.totalorder %s814_s0, %s814_s0 }
  0x84   :  { %578 = vmatprep.subr.bf16.mxu0 %v855_v0  ;;  %v214_v20 = vld [vmem:[#allocation8 + $0x28] sm:$0xff]  ;;  %v585_v21 = vpack.c.bf16 %v122_v17, %v121_v16  ;;  %v123_v22 = vld [vmem:[#allocation5 + $0x40] sm:$0xff]  ;;  %v215_v25 = vld [vmem:[#allocation8 + $0x30] sm:$0xff] }
  0x85   :  { %601 = vmatpush3.bf16.msra.mxu1 %v600_v15  ;;  %v124_v23 = vld [vmem:[#allocation5 + $0x48] sm:$0xff]  ;;  %v606_v24 = vpack.c.bf16 %v214_v20, %v213_v19  ;;  %v216_v26 = vld [vmem:[#allocation8 + $0x38] sm:$0xff]  ;;  %v125_v28 = vld [vmem:[#allocation5 + $0x50] sm:$0xff]  ;;  %p821_p3 = por %p820_p2, %p819_p1 }
  0x86   :  { %602 = vmatprep.subr.bf16.mxu1 %v855_v0  ;;  %v588_v27 = vpack.c.bf16 %v124_v23, %v123_v22  ;;  %v126_v29 = vld [vmem:[#allocation5 + $0x58] sm:$0xff]  ;;  %v609_v30 = vpack.c.bf16 %v216_v26, %v215_v25  ;;  %v217_v31 = vld [vmem:[#allocation8 + $0x40] sm:$0xff]  ;;  %v218_v32 = vld [vmem:[#allocation8 + $0x48] sm:$0xff] }
  0x87   :  { %580 = vmatpush3.bf16.msra.mxu0 %v579_v7  ;;  %v591_v33 = vpack.c.bf16 %v126_v29, %v125_v28  ;;  %v127_v34 = vld [vmem:[#allocation5 + $0x60] sm:$0xff]  ;;  %v128_v35 = vld [vmem:[#allocation5 + $0x68] sm:$0xff]  ;;  %v612_v36 = vpack.c.bf16 %v218_v32, %v217_v31  ;;  %v219_v37 = vld [vmem:[#allocation8 + $0x50] sm:$0xff]  ;;  %p822_p4 = pnand %p821_p3, %p815_p0 }
  0x88   :  { %581 = vmatprep.subr.bf16.mxu0 %v855_v0  ;;  %v220_v38 = vld [vmem:[#allocation8 + $0x58] sm:$0xff]  ;;  %v594_v39 = vpack.c.bf16 %v128_v35, %v127_v34  ;;  %v129_v40 = vld [vmem:[#allocation5 + $0x70] sm:$0xff]  ;;  %v221_v43 = vld [vmem:[#allocation8 + $0x60] sm:$0xff] }
  0x89   :  { %604 = vmatpush3.bf16.msra.mxu1 %v603_v18  ;;  %v130_v41 = vld [vmem:[#allocation5 + $0x78] sm:$0xff]  ;;  %v615_v42 = vpack.c.bf16 %v220_v38, %v219_v37  ;;  %v222_v44 = vld [vmem:[#allocation8 + $0x68] sm:$0xff]  ;;  %v416_v9 = vld [vmem:[#allocation7] ss:$0 sm:$0xff] }
  0x8a   :  { %605 = vmatprep.subr.bf16.mxu1 %v855_v0  ;;  %v597_v45 = vpack.c.bf16 %v130_v41, %v129_v40  ;;  %v618_v46 = vpack.c.bf16 %v222_v44, %v221_v43  ;;  %v114_v47 = vld [vmem:[#allocation2] sm:$0xff]  ;;  %v303_v51 = vld [vmem:[#allocation11] sm:$0xff]  ;;  %v304_v52 = vld [vmem:[#allocation11 + $0x8] sm:$0xff] }
  0x8b   :  { %583 = vmatpush3.bf16.msra.mxu0 %v582_v14  ;;  %v223_v48 = vld [vmem:[#allocation8 + $0x70] sm:$0xff]  ;;  %v224_v49 = vld [vmem:[#allocation8 + $0x78] sm:$0xff]  ;;  %v624_v54 = vpack.c.bf16 %v304_v52, %v303_v51  ;;  %v307_v57 = vld [vmem:[#allocation11 + $0x20] sm:$0xff] }
  0x8c   :  { %584 = vmatprep.subr.bf16.mxu0 %v855_v0  ;;  %v621_v50 = vpack.c.bf16 %v224_v49, %v223_v48  ;;  %v305_v53 = vld [vmem:[#allocation11 + $0x10] sm:$0xff]  ;;  %v306_v55 = vld [vmem:[#allocation11 + $0x18] sm:$0xff]  ;;  %v308_v58 = vld [vmem:[#allocation11 + $0x28] sm:$0xff] }
  0x8d   :  { %607 = vmatpush3.bf16.msra.mxu1 %v606_v24  ;;  %v627_v56 = vpack.c.bf16 %v306_v55, %v305_v53  ;;  %v630_v59 = vpack.c.bf16 %v308_v58, %v307_v57  ;;  %v309_v60 = vld [vmem:[#allocation11 + $0x30] sm:$0xff]  ;;  %v310_v61 = vld [vmem:[#allocation11 + $0x38] sm:$0xff]  ;;  %v311_v63 = vld [vmem:[#allocation11 + $0x40] sm:$0xff] }
  0x8e   :  { %608 = vmatprep.subr.bf16.mxu1 %v855_v0  ;;  %v633_v62 = vpack.c.bf16 %v310_v61, %v309_v60  ;;  %v313_v3 = vld [vmem:[#allocation11 + $0x50] sm:$0xff]  ;;  %v314_v4 = vld [vmem:[#allocation11 + $0x58] sm:$0xff]  ;;  %v315_v6 = vld [vmem:[#allocation11 + $0x60] sm:$0xff] }
  0x8f   :  { %586 = vmatpush3.bf16.msra.mxu0 %v585_v21  ;;  %v639_v5 = vpack.c.bf16 %v314_v4, %v313_v3  ;;  %v316_v7 = vld [vmem:[#allocation11 + $0x68] sm:$0xff]  ;;  %v317_v14 = vld [vmem:[#allocation11 + $0x70] sm:$0xff]  ;;  %v318_v15 = vld [vmem:[#allocation11 + $0x78] sm:$0xff] }
  0x90   :  { %587 = vmatprep.subr.bf16.mxu0 %v855_v0  ;;  %v642_v8 = vpack.c.bf16 %v316_v7, %v315_v6  ;;  %v645_v16 = vpack.c.bf16 %v318_v15, %v317_v14  ;;  %v417_v17 = vld [vmem:[#allocation10] ss:$0 sm:$0xff]  ;;  %v418_v22 = vld [vmem:[#allocation13] ss:$0 sm:$0xff] }
  0x91   :  { %610 = vmatpush3.bf16.msra.mxu1 %v609_v30 }
  0x92   :  { %611 = vmatprep.subr.bf16.mxu1 %v855_v0 }
  0x93   :  { %589 = vmatpush3.bf16.msra.mxu0 %v588_v27 }
  0x94   :  { %590 = vmatprep.subr.bf16.mxu0 %v855_v0 }
  0x95   :  { %613 = vmatpush3.bf16.msra.mxu1 %v612_v36 }
  0x96   :  { %614 = vmatprep.subr.bf16.mxu1 %v855_v0 }
  0x97   :  { %592 = vmatpush3.bf16.msra.mxu0 %v591_v33 }
  0x98   :  { %593 = vmatprep.subr.bf16.mxu0 %v855_v0 }
  0x99   :  { %616 = vmatpush3.bf16.msra.mxu1 %v615_v42 }
  0x9a   :  { %617 = vmatprep.subr.bf16.mxu1 %v855_v0 }
  0x9b   :  { %595 = vmatpush3.bf16.msra.mxu0 %v594_v39 }
  0x9c   :  { %596 = vmatprep.subr.bf16.mxu0 %v855_v0 }
  0x9d   :  { %619 = vmatpush3.bf16.msra.mxu1 %v618_v46 }
  0x9e   :  { %620 = vmatprep.subr.bf16.mxu1 %v855_v0 }
  0x9f   :  { %598 = vmatpush3.bf16.msra.mxu0 %v597_v45 }
  0xa0   :  { %623 = vmatprep.subr.bf16.mxu0 %v855_v0 }
  0xa1   :  { %622 = vmatpush3.bf16.msra.mxu1 %v621_v50 }
  0xa2   :  { %503 = vmatmul.mubr.f32.vlgmr.msra.gmra.mrb[0].mxu0 %v114_v47 }
  0xa3   :  { %572 = vmatprep.mubr.msk.f32.mxu0 %vm856_vm0, %v857_v1  ;;  %625 = vmatpush3.bf16.msra.mxu0 %v624_v54  ;;  %v312_v1 = vld [vmem:[#allocation11 + $0x48] sm:$0xff] }
  0xa4   :  { %626 = vmatprep.subr.bf16.mxu0 %v855_v0  ;;  %v636_v2 = vpack.c.bf16 %v312_v1, %v311_v63 }
  0xa7   :  { %628 = vmatpush3.bf16.msra.mxu0 %v627_v56 }
  0xa8   :  { %629 = vmatprep.subr.bf16.mxu0 %v855_v0 }
  0xab   :  { %631 = vmatpush3.bf16.msra.mxu0 %v630_v59 }
  0xac   :  { %632 = vmatprep.subr.bf16.mxu0 %v855_v0 }
  0xaf   :  { %634 = vmatpush3.bf16.msra.mxu0 %v633_v62 }
  0xb0   :  { %635 = vmatprep.subr.bf16.mxu0 %v855_v0 }
  0xb3   :  { %637 = vmatpush3.bf16.msra.mxu0 %v636_v2 }
  0xb4   :  { %638 = vmatprep.subr.bf16.mxu0 %v855_v0 }
  0xb7   :  { %640 = vmatpush3.bf16.msra.mxu0 %v639_v5 }
  0xb8   :  { %641 = vmatprep.subr.bf16.mxu0 %v855_v0 }
  0xbb   :  { %643 = vmatpush3.bf16.msra.mxu0 %v642_v8 }
  0xbc   :  { %644 = vmatprep.subr.bf16.mxu0 %v855_v0 }
  0xbf   :  { %646 = vmatpush3.bf16.msra.mxu0 %v645_v16 }
 0x175   :  { %v204_v10 = vpop.f32.mrb[0].mxu0 }
 0x176   :  { %v205_v11 = vadd.f32 %v416_v9, %v204_v10  ;;  %v504_v12 = vpop.f32.mrb[1].mxu0 }
 0x178   :  { %v208_v13 = vmax.f32 %v205_v11, 0.0 }
 0x17a   :  { %538 = vmatmul.mubr.f32.vlgmr.msra.gmra.mrb[0].mxu1 %v208_v13 }
 0x24d   :  { %v298_v18 = vpop.f32.mrb[0].mxu1 }
 0x24e   :  { %v299_v19 = vadd.f32 %v417_v17, %v298_v18  ;;  %v539_v20 = vpop.f32.mrb[1].mxu1 }
 0x250   :  { %v302_v21 = vmax.f32 %v299_v19, 0.0 }
 0x252   :  { %573 = vmatmul.mubr.f32.vlgmr.msra.gmra.mrb[2].mxu0 %v302_v21 }
 0x325   :  { %v392_v23 = vpop.f32.mrb[2].mxu0 }
 0x326   :  { %v393_v0 = vadd.f32 %v418_v22, %v392_v23  ;;  %v574_v24 = vpop.f32.mrb[3].mxu0 }
 0x328   :  { %v396_v25 = vmax.f32 %v393_v0, 0.0 }
 0x32a   :  { %397 = vst [vmem:[#allocation14] sm:$0xff] %v396_v25 }
 0x32b   :  { %825 = shalt.err (!%p822_p4)
}
 0x32c   :  { %s826_s15 = scalar_lea.hbm %s1041_s7, 128 }
 0x32d   :  { %p827_p5 = scmp.ne.s32.totalorder %s1041_s7, %s826_s15  ;;  %p830_p6 = scmp.lt.u32.totalorder %s826_s15, %s1041_s7 }
 0x32f   :  { %p832_p7 = pnand %p830_p6, %p827_p5 }
 0x331   :  { %835 = shalt.err (!%p832_p7)
}
 0x332   :  { %407 = dma.vmem_to_hbm [thread:$0]  %s405_s13, 128, %s1041_s7, [#allocation4]  }
 0x333   :  { %844 = dma.done.wait [#allocation4], 128  }
 0x334   :  { %845 = vsyncadd [#allocation4], 4294967168 }
 0x335   :  { %411 = vsyncpa [#allocation3], 1 }
 0x336   :  { %412 = vsyncpa [#allocation6], 1 }
 0x337   :  { %413 = vsyncpa [#allocation9], 1 }
 0x338   :  { %414 = vsyncpa [#allocation12], 1 }
 0x339   :  { %415 = vsyncpa [#allocation4], 1 }

</bundles_post_ra>
